<compile_context>
chip_gen: v5e
topology: v5e:2x2
jax: 0.10.0
libtpu: 0.0.40
codegen_flags: <defaults>
</compile_context>

<pallas_src>
import jax
import jax.numpy as jnp
import numpy as np
from jax.experimental import pallas as pl
from jax.experimental.pallas import tpu as pltpu


def local_mixer_kernel(x_ref, w_ref, shift_ref, o_ref):
    # x_ref:     (BM, 3*(W+2)*C)   im2row input rows (matmul dtype, e.g. bf16)
    # w_ref:     (3*(W+2)*C, W*C)  banded conv weights (kh/kw taps + BN scale
    #                              folded in); constant across the grid.
    # shift_ref: (1, W*C)          BN shift (= (bias - mean)*scale + beta), f32
    # o_ref:     (BM, W*C)         lane-dense output block
    acc = jnp.dot(x_ref[...], w_ref[...], preferred_element_type=jnp.float32)
    # Fused BatchNorm shift + ReLU (scale already folded into the weights).
    o_ref[...] = jnp.maximum(acc + shift_ref[...], 0.0).astype(o_ref.dtype)


def prepare_local_mixer_params(w_hwio, conv_bias, gamma, beta, run_mean,
                               run_var, *, W, eps=1e-5,
                               matmul_dtype=jnp.bfloat16):
    """Build the banded im2row weight slab + BN shift ONCE (hoisted off the
    per-call path).  matmul_dtype defaults to bf16 on all generations (f32
    accumulation in-kernel); pass jnp.float32 only for bit-tight checks."""
    C = w_hwio.shape[-1]

    # Fold BN (eval mode, running stats) + conv bias into per-channel affine,
    # and fold the BN scale straight into the conv weights.
    scale = gamma / jnp.sqrt(run_var + eps)
    shift = (conv_bias - run_mean) * scale + beta
    w_scaled = w_hwio * scale[None, None, None, :]            # (3, 3, C, C)

    # Banded block-weights: w_band[kh][(w+kw)*C + ci, w*C + co] = w[kh,kw,ci,co]
    sel = np.zeros((3, W + 2, W), np.float32)
    for kw in range(3):
        sel[kw, kw:kw + W, :] = np.eye(W, dtype=np.float32)
    sel = jnp.asarray(sel)
    w_big = jnp.concatenate([
        sum(jnp.kron(sel[kw], w_scaled[kh, kw]) for kw in range(3))
        for kh in range(3)
    ], axis=0).astype(matmul_dtype)                           # (3*(W+2)*C, W*C)

    shift_big = jnp.tile(shift, W).reshape(1, W * C).astype(jnp.float32)
    return w_big, shift_big


def local_mixer_apply(x_nhwc, w_big, shift_big):
    """Forward pass of LocalMixer.  x_nhwc: [N, H, W, C]."""
    N, H, W, C = x_nhwc.shape
    K = 3 * (W + 2) * C
    WC = W * C
    assert w_big.shape == (K, WC) and shift_big.shape == (1, WC)

    # VMEM-scaling guard (v7x has 64 MiB physical / 32 MiB scoped default):
    # for large dim, tile the output-lane (W*C) axis with a second grid axis
    # and mark the constant weight spec pipeline_mode=pl.Buffered(1).
    w_bytes = int(np.prod(w_big.shape)) * jnp.dtype(w_big.dtype).itemsize
    assert 2 * w_bytes < 24 * 1024 * 1024, (
        "weight slab too large for resident single-slab design; tile W*C axis")

    # Spatial same-padding + im2row over kh + flatten (W, C) into lanes.
    # Cast to the matmul dtype ONCE here (halves input DMA, no in-kernel casts).
    x_pad = jnp.pad(x_nhwc, ((0, 0), (1, 1), (1, 1), (0, 0)))
    x_rows = x_pad.reshape(N, H + 2, (W + 2) * C)
    x_im2row = jnp.concatenate(
        [x_rows[:, 0:H], x_rows[:, 1:H + 1], x_rows[:, 2:H + 2]], axis=-1)
    x_flat = x_im2row.reshape(N * H, K).astype(w_big.dtype)   # (M, K)

    # Fold the batch into M and block it so the MXU sees up to 256 rows/step.
    M = N * H
    BM = next((b for b in (256, 128, 64, 32, 16, 8) if M % b == 0), M)

    out = pl.pallas_call(
        local_mixer_kernel,
        out_shape=jax.ShapeDtypeStruct((M, WC), x_nhwc.dtype),
        grid=(M // BM,),
        in_specs=[
            pl.BlockSpec((BM, K), lambda m: (m, 0)),
            pl.BlockSpec((K, WC), lambda m: (0, 0)),   # constant -> DMA'd once
            pl.BlockSpec((1, WC), lambda m: (0, 0)),   # constant -> DMA'd once
        ],
        out_specs=pl.BlockSpec((BM, WC), lambda m: (m, 0)),
        compiler_params=pltpu.CompilerParams(
            # Row blocks are independent; on v7x they split across the 2 TCs
            # (note: this duplicates the small resident weight DMA per TC).
            dimension_semantics=("parallel",)),
    )(x_flat, w_big, shift_big)

    return out.reshape(N, H, W, C)


local_mixer = jax.jit(local_mixer_apply)


def _reference(x_nhwc, w_hwio, conv_bias, gamma, beta, run_mean, run_var,
               eps=1e-5):
    y = jax.lax.conv_general_dilated(
        x_nhwc, w_hwio, window_strides=(1, 1), padding="SAME",
        dimension_numbers=("NHWC", "HWIO", "NHWC"))
    y = y + conv_bias
    y = (y - run_mean) / jnp.sqrt(run_var + eps) * gamma + beta
    return jnp.maximum(y, 0.0)


if __name__ == "__main__":
    N, C, H, W = 2, 16, 16, 16          # batch=2, dim=16, spatial=16x16
    key = jax.random.PRNGKey(0)
    k_x, k_w, k_b, k_g, k_be, k_m, k_v = jax.random.split(key, 7)

    # PyTorch input would be NCHW [N, C, H, W]; kernel consumes NHWC.
    x = jax.random.normal(k_x, (N, H, W, C), dtype=jnp.float32)

    # Deterministic parameter init (shapes from LocalMixer.__init__):
    #   conv: weight [3,3,C_in,C_out] (HWIO), bias [C]
    #   bn:   gamma/beta/running_mean/running_var [C]
    w_hwio = 0.1 * jax.random.normal(k_w, (3, 3, C, C), dtype=jnp.float32)
    conv_bias = 0.1 * jax.random.normal(k_b, (C,), dtype=jnp.float32)
    gamma = 1.0 + 0.1 * jax.random.normal(k_g, (C,), dtype=jnp.float32)
    beta = 0.1 * jax.random.normal(k_be, (C,), dtype=jnp.float32)
    run_mean = 0.1 * jax.random.normal(k_m, (C,), dtype=jnp.float32)
    run_var = jnp.abs(jax.random.normal(k_v, (C,), dtype=jnp.float32)) + 0.5
    # TODO(synk): PyTorch BatchNorm2d in train mode uses batch statistics;
    # this implements eval-mode (running-stats) normalization.

    ref = _reference(x, w_hwio, conv_bias, gamma, beta, run_mean, run_var)

    # Default perf path: bf16 weights + bf16 im2row input, f32 accumulation.
    # (bf16 cannot meet 1e-5/1e-4 vs. an f32 reference -> loosened tolerances.)
    w_big, shift_big = prepare_local_mixer_params(
        w_hwio, conv_bias, gamma, beta, run_mean, run_var, W=W)
    out = jax.block_until_ready(local_mixer(x, w_big, shift_big))
    np.testing.assert_allclose(np.asarray(out), np.asarray(ref),
                               rtol=2e-2, atol=2e-2)

    # Bit-tight correctness check of the same kernel with f32 matmuls.
    w_big32, shift_big32 = prepare_local_mixer_params(
        w_hwio, conv_bias, gamma, beta, run_mean, run_var, W=W,
        matmul_dtype=jnp.float32)
    out32 = jax.block_until_ready(local_mixer(x, w_big32, shift_big32))
    np.testing.assert_allclose(np.asarray(out32), np.asarray(ref),
                               rtol=1e-5, atol=1e-4)

    print("KERNEL_OK")
</pallas_src>

<mosaic_0001>
module attributes {stable_mosaic.version = 11 : i64} {
  func.func @local_mixer_kernel(%arg0: i32, %arg1: memref<32x864xbf16, #tpu.memory_space<vmem>>, %arg2: memref<864x256xbf16, #tpu.memory_space<vmem>>, %arg3: memref<1x256xf32, #tpu.memory_space<vmem>>, %arg4: memref<32x256xf32, #tpu.memory_space<vmem>>) attributes {dimension_semantics = [#tpu.dimension_semantics<parallel>], iteration_bounds = array<i64: 1>, scalar_prefetch = 0 : i64, scratch_operands = 0 : i64, tpu.core_type = #tpu.core_type<tc>, window_params = [{transform_indices = @transform_0, window_bounds = array<i64: 32, 864>}, {pipeline_mode = #tpu.pipeline_mode<synchronous>, transform_indices = @transform_1, window_bounds = array<i64: 864, 256>}, {pipeline_mode = #tpu.pipeline_mode<synchronous>, transform_indices = @transform_2, window_bounds = array<i64: 1, 256>}, {transform_indices = @transform_3, window_bounds = array<i64: 32, 256>}]} {
    %c0 = arith.constant 0 : index
    %c0_0 = arith.constant 0 : index
    %0 = vector.load %arg1[%c0, %c0_0] : memref<32x864xbf16, #tpu.memory_space<vmem>>, vector<32x864xbf16>
    %c0_1 = arith.constant 0 : index
    %c0_2 = arith.constant 0 : index
    %1 = vector.load %arg2[%c0_1, %c0_2] : memref<864x256xbf16, #tpu.memory_space<vmem>>, vector<864x256xbf16>
    %cst = arith.constant dense<0.000000e+00> : vector<32x256xf32>
    %2 = tpu.matmul %0, %1, %cst {dimension_numbers = #tpu.dot_dimension_numbers<[1], [0], [0], [1], [0, 0, 1, 1], [], []>} : vector<32x864xbf16>, vector<864x256xbf16>, vector<32x256xf32> -> vector<32x256xf32>
    %c0_3 = arith.constant 0 : index
    %c0_4 = arith.constant 0 : index
    %3 = vector.load %arg3[%c0_3, %c0_4] : memref<1x256xf32, #tpu.memory_space<vmem>>, vector<1x256xf32>
    %4 = vector.broadcast %3 : vector<1x256xf32> to vector<32x256xf32>
    %5 = arith.addf %2, %4 : vector<32x256xf32>
    %cst_5 = arith.constant 0.000000e+00 : f32
    %6 = vector.broadcast %cst_5 : f32 to vector<32x256xf32>
    %7 = arith.maximumf %5, %6 : vector<32x256xf32>
    %c0_6 = arith.constant 0 : index
    %c0_7 = arith.constant 0 : index
    %8 = vector.load %arg4[%c0_6, %c0_7] : memref<32x256xf32, #tpu.memory_space<vmem>>, vector<32x256xf32>
    tpu.vector_store %arg4[%c0_6, %c0_7], %7 {strides = array<i32>} : memref<32x256xf32, #tpu.memory_space<vmem>>, vector<32x256xf32>,
    return
  }
  func.func @transform_0(%arg0: i32) -> (i32, i32) {
    %c0_i32 = arith.constant 0 : i32
    %c0_i32_0 = arith.constant 0 : i32
    return %arg0, %c0_i32 : i32, i32
  }
  func.func @transform_1(%arg0: i32) -> (i32, i32) {
    %c0_i32 = arith.constant 0 : i32
    %c0_i32_0 = arith.constant 0 : i32
    %c0_i32_1 = arith.constant 0 : i32
    return %c0_i32, %c0_i32_0 : i32, i32
  }
  func.func @transform_2(%arg0: i32) -> (i32, i32) {
    %c0_i32 = arith.constant 0 : i32
    %c0_i32_0 = arith.constant 0 : i32
    %c0_i32_1 = arith.constant 0 : i32
    return %c0_i32, %c0_i32_0 : i32, i32
  }
  func.func @transform_3(%arg0: i32) -> (i32, i32) {
    %c0_i32 = arith.constant 0 : i32
    %c0_i32_0 = arith.constant 0 : i32
    return %arg0, %c0_i32 : i32, i32
  }
}

</mosaic_0001>

<bundles_post_ra>
// kernel: local_mixer_apply.1
= control target key start
LH: loop header
LB: loop body
LE: loop exit
PB: predicated region body
PF: predicated region fallthrough
CT: control target
= control target key end

     0   :  { %vm755_vm0 = vcmask 785408   ;;  %s2519_s1 = inlined_call_operand.vmem [shape: bf16[864,256], index: 1, kind: input, shape index: {}]   ;;  %s2520_s0 = inlined_call_operand.vmem [shape: bf16[32,864], index: 0, kind: input, shape index: {}]   ;;  %s2521_s2 = inlined_call_operand.vmem [shape: f32[1,256], index: 2, kind: input, shape index: {}]   ;;  %s2522_s3 = inlined_call_operand.vmem [shape: f32[32,256], index: 3, kind: output, shape index: {}]  }
   0x1   :  { %v1162_v0 = vld [vmem:[%s2519_s1 + $0x70] sm:$0xf]  ;;  %v1569_v1 = vld [vmem:[%s2519_s1 + $0x74] sm:$0xf0]  ;;  %v1154_v11 = vld [vmem:[%s2519_s1 + $0x60] sm:$0xf] }
   0x2   :  { %v1226_v2 = vld [vmem:[%s2519_s1 + $0xf0] sm:$0xf]  ;;  %v1163_v3 = vor.u32 %v1569_v1, %v1162_v0  ;;  %v1585_v4 = vld [vmem:[%s2519_s1 + $0xf4] sm:$0xf0]  ;;  %v1567_v13 = vld [vmem:[%s2519_s1 + $0x64] sm:$0xf0] }
   0x3   :  { %v1290_v5 = vld [vmem:[%s2519_s1 + $0x170] sm:$0xf]  ;;  %v1601_v6 = vld [vmem:[%s2519_s1 + $0x174] sm:$0xf0]  ;;  %v1227_v7 = vor.u32 %v1585_v4, %v1226_v2  ;;  %v1218_v14 = vld [vmem:[%s2519_s1 + $0xe0] sm:$0xf]  ;;  %v1155_v16 = vor.u32 %v1567_v13, %v1154_v11 }
   0x4   :  { %v1291_v8 = vor.u32 %v1601_v6, %v1290_v5  ;;  %v1354_v9 = vld [vmem:[%s2519_s1 + $0x1f0] sm:$0xf]  ;;  %v1617_v10 = vld [vmem:[%s2519_s1 + $0x1f4] sm:$0xf0]  ;;  %762 = vmatpush.bf16.msra.mxu0 %v1163_v3  ;;  %v1583_v15 = vld [vmem:[%s2519_s1 + $0xe4] sm:$0xf0] }
   0x5   :  { %v1355_v12 = vor.u32 %v1617_v10, %v1354_v9  ;;  %781 = vmatpush.bf16.msra.mxu1 %v1227_v7  ;;  %v1219_v17 = vor.u32 %v1583_v15, %v1218_v14  ;;  %v1282_v18 = vld [vmem:[%s2519_s1 + $0x160] sm:$0xf]  ;;  %v1599_v19 = vld [vmem:[%s2519_s1 + $0x164] sm:$0xf0]  ;;  %v1146_v23 = vld [vmem:[%s2519_s1 + $0x50] sm:$0xf] }
   0x6   :  { %800 = vmatpush.bf16.msra.mxu2 %v1291_v8  ;;  %v1346_v20 = vld [vmem:[%s2519_s1 + $0x1e0] sm:$0xf]  ;;  %v1283_v21 = vor.u32 %v1599_v19, %v1282_v18  ;;  %v1615_v22 = vld [vmem:[%s2519_s1 + $0x1e4] sm:$0xf0]  ;;  %v1565_v24 = vld [vmem:[%s2519_s1 + $0x54] sm:$0xf0] }
   0x7   :  { %819 = vmatpush.bf16.msra.mxu3 %v1355_v12  ;;  %v1347_v25 = vor.u32 %v1615_v22, %v1346_v20  ;;  %v1210_v26 = vld [vmem:[%s2519_s1 + $0xd0] sm:$0xf]  ;;  %v1581_v27 = vld [vmem:[%s2519_s1 + $0xd4] sm:$0xf0]  ;;  %v1147_v29 = vor.u32 %v1565_v24, %v1146_v23  ;;  %v1138_v35 = vld [vmem:[%s2519_s1 + $0x40] sm:$0xf] }
   0x8   :  { %v1274_v28 = vld [vmem:[%s2519_s1 + $0x150] sm:$0xf]  ;;  %763 = vmatpush.bf16.msra.mxu0 %v1155_v16  ;;  %v1597_v30 = vld [vmem:[%s2519_s1 + $0x154] sm:$0xf0]  ;;  %v1211_v33 = vor.u32 %v1581_v27, %v1210_v26  ;;  %v1563_v36 = vld [vmem:[%s2519_s1 + $0x44] sm:$0xf0] }
   0x9   :  { %v1338_v31 = vld [vmem:[%s2519_s1 + $0x1d0] sm:$0xf]  ;;  %v1613_v32 = vld [vmem:[%s2519_s1 + $0x1d4] sm:$0xf0]  ;;  %782 = vmatpush.bf16.msra.mxu1 %v1219_v17  ;;  %v1275_v34 = vor.u32 %v1597_v30, %v1274_v28  ;;  %v1202_v37 = vld [vmem:[%s2519_s1 + $0xc0] sm:$0xf]  ;;  %v1139_v44 = vor.u32 %v1563_v36, %v1138_v35 }
   0xa   :  { %801 = vmatpush.bf16.msra.mxu2 %v1283_v21  ;;  %v1339_v38 = vor.u32 %v1613_v32, %v1338_v31  ;;  %v1579_v39 = vld [vmem:[%s2519_s1 + $0xc4] sm:$0xf0]  ;;  %v1266_v40 = vld [vmem:[%s2519_s1 + $0x140] sm:$0xf]  ;;  %v1130_v47 = vld [vmem:[%s2519_s1 + $0x30] sm:$0xf] }
   0xb   :  { %820 = vmatpush.bf16.msra.mxu3 %v1347_v25  ;;  %v1595_v41 = vld [vmem:[%s2519_s1 + $0x144] sm:$0xf0]  ;;  %v1330_v42 = vld [vmem:[%s2519_s1 + $0x1c0] sm:$0xf]  ;;  %v1203_v45 = vor.u32 %v1579_v39, %v1202_v37  ;;  %v1561_v48 = vld [vmem:[%s2519_s1 + $0x34] sm:$0xf0] }
   0xc   :  { %v1611_v43 = vld [vmem:[%s2519_s1 + $0x1c4] sm:$0xf0]  ;;  %764 = vmatpush.bf16.msra.mxu0 %v1147_v29  ;;  %v1267_v46 = vor.u32 %v1595_v41, %v1266_v40  ;;  %v1194_v49 = vld [vmem:[%s2519_s1 + $0xb0] sm:$0xf]  ;;  %v1577_v51 = vld [vmem:[%s2519_s1 + $0xb4] sm:$0xf0]  ;;  %v1131_v56 = vor.u32 %v1561_v48, %v1130_v47 }
   0xd   :  { %783 = vmatpush.bf16.msra.mxu1 %v1211_v33  ;;  %v1331_v50 = vor.u32 %v1611_v43, %v1330_v42  ;;  %v1258_v52 = vld [vmem:[%s2519_s1 + $0x130] sm:$0xf]  ;;  %v1593_v53 = vld [vmem:[%s2519_s1 + $0x134] sm:$0xf0]  ;;  %v1195_v57 = vor.u32 %v1577_v51, %v1194_v49  ;;  %v1122_v59 = vld [vmem:[%s2519_s1 + $0x20] sm:$0xf] }
   0xe   :  { %802 = vmatpush.bf16.msra.mxu2 %v1275_v34  ;;  %v1322_v54 = vld [vmem:[%s2519_s1 + $0x1b0] sm:$0xf]  ;;  %v1609_v55 = vld [vmem:[%s2519_s1 + $0x1b4] sm:$0xf0]  ;;  %v1259_v58 = vor.u32 %v1593_v53, %v1258_v52  ;;  %v1559_v60 = vld [vmem:[%s2519_s1 + $0x24] sm:$0xf0] }
   0xf   :  { %821 = vmatpush.bf16.msra.mxu3 %v1339_v38  ;;  %v1186_v61 = vld [vmem:[%s2519_s1 + $0xa0] sm:$0xf]  ;;  %v1323_v62 = vor.u32 %v1609_v55, %v1322_v54  ;;  %v1575_v63 = vld [vmem:[%s2519_s1 + $0xa4] sm:$0xf0]  ;;  %v1123_v4 = vor.u32 %v1559_v60, %v1122_v59  ;;  %v1114_v7 = vld [vmem:[%s2519_s1 + $0x10] sm:$0xf] }
  0x10   :  { %765 = vmatpush.bf16.msra.mxu0 %v1139_v44  ;;  %v1250_v0 = vld [vmem:[%s2519_s1 + $0x120] sm:$0xf]  ;;  %v1591_v1 = vld [vmem:[%s2519_s1 + $0x124] sm:$0xf0]  ;;  %v1187_v5 = vor.u32 %v1575_v63, %v1186_v61  ;;  %v1557_v8 = vld [vmem:[%s2519_s1 + $0x14] sm:$0xf0] }
  0x11   :  { %784 = vmatpush.bf16.msra.mxu1 %v1203_v45  ;;  %v1314_v2 = vld [vmem:[%s2519_s1 + $0x1a0] sm:$0xf]  ;;  %v1607_v3 = vld [vmem:[%s2519_s1 + $0x1a4] sm:$0xf0]  ;;  %v1251_v6 = vor.u32 %v1591_v1, %v1250_v0  ;;  %v1178_v9 = vld [vmem:[%s2519_s1 + $0x90] sm:$0xf]  ;;  %v1115_v17 = vor.u32 %v1557_v8, %v1114_v7 }
  0x12   :  { %803 = vmatpush.bf16.msra.mxu2 %v1267_v46  ;;  %v1315_v10 = vor.u32 %v1607_v3, %v1314_v2  ;;  %v1573_v11 = vld [vmem:[%s2519_s1 + $0x94] sm:$0xf0]  ;;  %v1242_v12 = vld [vmem:[%s2519_s1 + $0x110] sm:$0xf]  ;;  %v1106_v16 = vld [vmem:[%s2519_s1] sm:$0xf] }
  0x13   :  { %822 = vmatpush.bf16.msra.mxu3 %v1331_v50  ;;  %v1589_v13 = vld [vmem:[%s2519_s1 + $0x114] sm:$0xf0]  ;;  %v1306_v14 = vld [vmem:[%s2519_s1 + $0x190] sm:$0xf]  ;;  %v1555_v18 = vld [vmem:[%s2519_s1 + $0x4] sm:$0xf0]  ;;  %v1179_v21 = vor.u32 %v1573_v11, %v1178_v9 }
  0x14   :  { %766 = vmatpush.bf16.msra.mxu0 %v1131_v56  ;;  %v1605_v15 = vld [vmem:[%s2519_s1 + $0x194] sm:$0xf0]  ;;  %v1170_v19 = vld [vmem:[%s2519_s1 + $0x80] sm:$0xf]  ;;  %v1571_v20 = vld [vmem:[%s2519_s1 + $0x84] sm:$0xf0]  ;;  %v1243_v22 = vor.u32 %v1589_v13, %v1242_v12  ;;  %v1107_v34 = vor.u32 %v1555_v18, %v1106_v16 }
  0x15   :  { %785 = vmatpush.bf16.msra.mxu1 %v1195_v57  ;;  %v1234_v23 = vld [vmem:[%s2519_s1 + $0x100] sm:$0xf]  ;;  %v1587_v24 = vld [vmem:[%s2519_s1 + $0x104] sm:$0xf0]  ;;  %v1307_v26 = vor.u32 %v1605_v15, %v1306_v14  ;;  %v1543_v29 = vld [vmem:[%s2520_s0 + $0x18] sm:$0xf0]  ;;  %v1171_v38 = vor.u32 %v1571_v20, %v1170_v19 }
  0x16   :  { %804 = vmatpush.bf16.msra.mxu2 %v1259_v58  ;;  %v1298_v25 = vld [vmem:[%s2519_s1 + $0x180] sm:$0xf]  ;;  %v1603_v27 = vld [vmem:[%s2519_s1 + $0x184] sm:$0xf0]  ;;  %v1540_v30 = vld [vmem:[%s2520_s0 + $0x4] sm:$0xf]  ;;  %v1235_v39 = vor.u32 %v1587_v24, %v1234_v23 }
  0x17   :  { %823 = vmatpush.bf16.msra.mxu3 %v1323_v62  ;;  %v1050_v28 = vld [vmem:[%s2520_s0] sm:$0xf]  ;;  %v1530_v32 = vld [vmem:[%s2519_s1 + $0x350] sm:$0xf]  ;;  %v1661_v33 = vld [vmem:[%s2519_s1 + $0x354] sm:$0xf0]  ;;  %v1299_v43 = vor.u32 %v1603_v27, %v1298_v25 }
  0x18   :  { %767 = vmatpush.bf16.msra.mxu0 %v1123_v4  ;;  %v1052_v31 = vld [vmem:[%s2520_s0 + $0x1c] sm:$0xf0]  ;;  %v1058_v35 = vld [vmem:[%s2520_s0 + $0x8] sm:$0xf]  ;;  %v1482_v36 = vld [vmem:[%s2519_s1 + $0x2f0] sm:$0xf]  ;;  %v1531_v44 = vor.u32 %v1661_v33, %v1530_v32  ;;  %v1933_v48 = vor.u32 %v1543_v29, %v1050_v28 }
  0x19   :  { %786 = vmatpush.bf16.msra.mxu1 %v1187_v5  ;;  %v1649_v37 = vld [vmem:[%s2519_s1 + $0x2f4] sm:$0xf0]  ;;  %v1544_v40 = vld [vmem:[%s2520_s0 + $0x20] sm:$0xf0]  ;;  %v1541_v41 = vld [vmem:[%s2520_s0 + $0xc] sm:$0xf]  ;;  %v1944_v53 = vor.u32 %v1540_v30, %v1052_v31 }
  0x1a   :  { %805 = vmatpush.bf16.msra.mxu2 %v1251_v6  ;;  %v1060_v42 = vld [vmem:[%s2520_s0 + $0x24] sm:$0xf0]  ;;  %v1418_v45 = vld [vmem:[%s2519_s1 + $0x270] sm:$0xf]  ;;  %v1633_v46 = vld [vmem:[%s2519_s1 + $0x274] sm:$0xf0]  ;;  %v1483_v49 = vor.u32 %v1649_v37, %v1482_v36  ;;  %v1946_v54 = vor.u32 %v1544_v40, %v1058_v35 }
  0x1b   :  { %824 = vmatpush.bf16.msra.mxu3 %v1315_v10  ;;  %v1568_v47 = vld [vmem:[%s2519_s1 + $0x74] sm:$0xf]  ;;  %v1164_v50 = vld [vmem:[%s2519_s1 + $0x78] sm:$0xf0]  ;;  %v1522_v51 = vld [vmem:[%s2519_s1 + $0x340] sm:$0xf]  ;;  %v1954_v57 = vor.u32 %v1541_v41, %v1060_v42  ;;  %v1419_v58 = vor.u32 %v1633_v46, %v1418_v45 }
  0x1c   :  { %768 = vmatpush.bf16.msra.mxu0 %v1115_v17  ;;  %v1659_v52 = vld [vmem:[%s2519_s1 + $0x344] sm:$0xf0]  ;;  %v1474_v55 = vld [vmem:[%s2519_s1 + $0x2e0] sm:$0xf]  ;;  %v1167_v59 = vor.u32 %v1568_v47, %v1164_v50  ;;  %v1566_v62 = vld [vmem:[%s2519_s1 + $0x64] sm:$0xf] }
  0x1d   :  { %787 = vmatpush.bf16.msra.mxu1 %v1179_v21  ;;  %v1647_v56 = vld [vmem:[%s2519_s1 + $0x2e4] sm:$0xf0]  ;;  %v1410_v60 = vld [vmem:[%s2519_s1 + $0x260] sm:$0xf]  ;;  %v1523_v63 = vor.u32 %v1659_v52, %v1522_v51  ;;  %v1156_v1 = vld [vmem:[%s2519_s1 + $0x68] sm:$0xf0] }
  0x1e   :  { %806 = vmatpush.bf16.msra.mxu2 %v1243_v22  ;;  %v1631_v61 = vld [vmem:[%s2519_s1 + $0x264] sm:$0xf0]  ;;  %v1475_v0 = vor.u32 %v1647_v56, %v1474_v55  ;;  %v1514_v2 = vld [vmem:[%s2519_s1 + $0x330] sm:$0xf]  ;;  %v1657_v3 = vld [vmem:[%s2519_s1 + $0x334] sm:$0xf0]  ;;  %v1159_v7 = vor.u32 %v1566_v62, %v1156_v1 }
  0x1f   :  { %825 = vmatpush.bf16.msra.mxu3 %v1307_v26  ;;  %v1466_v4 = vld [vmem:[%s2519_s1 + $0x2d0] sm:$0xf]  ;;  %v1645_v5 = vld [vmem:[%s2519_s1 + $0x2d4] sm:$0xf0]  ;;  %v1411_v6 = vor.u32 %v1631_v61, %v1410_v60  ;;  %v1564_v10 = vld [vmem:[%s2519_s1 + $0x54] sm:$0xf]  ;;  %v1515_v11 = vor.u32 %v1657_v3, %v1514_v2 }
  0x20   :  { %769 = vmatpush.bf16.msra.mxu0 %v1107_v34  ;;  %v1402_v8 = vld [vmem:[%s2519_s1 + $0x250] sm:$0xf]  ;;  %v1629_v9 = vld [vmem:[%s2519_s1 + $0x254] sm:$0xf0]  ;;  %v1467_v12 = vor.u32 %v1645_v5, %v1466_v4  ;;  %v1148_v13 = vld [vmem:[%s2519_s1 + $0x58] sm:$0xf0] }
  0x21   :  { %788 = vmatpush.bf16.msra.mxu1 %v1171_v38  ;;  %v1506_v14 = vld [vmem:[%s2519_s1 + $0x320] sm:$0xf]  ;;  %v1655_v15 = vld [vmem:[%s2519_s1 + $0x324] sm:$0xf0]  ;;  %v1403_v18 = vor.u32 %v1629_v9, %v1402_v8  ;;  %v1562_v21 = vld [vmem:[%s2519_s1 + $0x44] sm:$0xf]  ;;  %v1151_v22 = vor.u32 %v1564_v10, %v1148_v13 }
  0x22   :  { %807 = vmatpush.bf16.msra.mxu2 %v1235_v39  ;;  %v1458_v16 = vld [vmem:[%s2519_s1 + $0x2c0] sm:$0xf]  ;;  %v1643_v17 = vld [vmem:[%s2519_s1 + $0x2c4] sm:$0xf0]  ;;  %v1140_v23 = vld [vmem:[%s2519_s1 + $0x48] sm:$0xf0]  ;;  %v1507_v26 = vor.u32 %v1655_v15, %v1506_v14 }
  0x23   :  { %826 = vmatpush.bf16.msra.mxu3 %v1299_v43  ;;  %770 = vmatmul.bf16.vlgmr.msra.gmra.mxu0 %v1933_v48  ;;  %v1394_v19 = vld [vmem:[%s2519_s1 + $0x240] sm:$0xf]  ;;  %v1627_v20 = vld [vmem:[%s2519_s1 + $0x244] sm:$0xf0]  ;;  %v1078_v24 = vld [vmem:[%s2520_s0 + $0x38] sm:$0xf]  ;;  %v1459_v27 = vor.u32 %v1643_v17, %v1458_v16  ;;  %v1143_v39 = vor.u32 %v1562_v21, %v1140_v23 }
  0x24   :  { %789 = vmatmul.bf16.vlgmr.msra.gmra.mxu1 %v1944_v53  ;;  %838 = vmatpush.bf16.msrb.mxu0 %v1419_v58  ;;  %v1550_v25 = vld [vmem:[%s2520_s0 + $0x50] sm:$0xf0]  ;;  %v1547_v28 = vld [vmem:[%s2520_s0 + $0x3c] sm:$0xf]  ;;  %v1080_v29 = vld [vmem:[%s2520_s0 + $0x54] sm:$0xf0]  ;;  %v1395_v35 = vor.u32 %v1627_v20, %v1394_v19 }
  0x25   :  { %857 = vmatpush.bf16.msrb.mxu1 %v1483_v49  ;;  %808 = vmatmul.bf16.vlgmr.msra.gmra.mxu2 %v1946_v54  ;;  %v1498_v30 = vld [vmem:[%s2519_s1 + $0x310] sm:$0xf]  ;;  %v1653_v31 = vld [vmem:[%s2519_s1 + $0x314] sm:$0xf0]  ;;  %v1086_v32 = vld [vmem:[%s2520_s0 + $0x40] sm:$0xf]  ;;  %v2076_v50 = vor.u32 %v1547_v28, %v1080_v29 }
  0x26   :  { %878 = vmatpush.bf16.msrb.mxu2 %v1531_v44  ;;  %827 = vmatmul.bf16.vlgmr.msra.gmra.mxu3 %v1954_v57  ;;  %v1450_v33 = vld [vmem:[%s2519_s1 + $0x2b0] sm:$0xf]  ;;  %v1641_v34 = vld [vmem:[%s2519_s1 + $0x2b4] sm:$0xf0]  ;;  %v1551_v36 = vld [vmem:[%s2520_s0 + $0x58] sm:$0xf0]  ;;  %v1499_v43 = vor.u32 %v1653_v31, %v1498_v30  ;;  %v2065_v44 = vor.u32 %v1550_v25, %v1078_v24 }
  0x27   :  { %895 = vmatpush.bf16.msrb.mxu3 %v1167_v59  ;;  %v1548_v37 = vld [vmem:[%s2520_s0 + $0x44] sm:$0xf]  ;;  %v1088_v38 = vld [vmem:[%s2520_s0 + $0x5c] sm:$0xf0]  ;;  %v1386_v40 = vld [vmem:[%s2519_s1 + $0x230] sm:$0xf]  ;;  %v1451_v45 = vor.u32 %v1641_v34, %v1450_v33  ;;  %v2078_v51 = vor.u32 %v1551_v36, %v1086_v32 }
  0x28   :  { %839 = vmatpush.bf16.msrb.mxu0 %v1411_v6  ;;  %v1625_v41 = vld [vmem:[%s2519_s1 + $0x234] sm:$0xf0]  ;;  %v1560_v42 = vld [vmem:[%s2519_s1 + $0x34] sm:$0xf]  ;;  %v1132_v46 = vld [vmem:[%s2519_s1 + $0x38] sm:$0xf0]  ;;  %v2086_v56 = vor.u32 %v1548_v37, %v1088_v38 }
  0x29   :  { %858 = vmatpush.bf16.msrb.mxu1 %v1475_v0  ;;  %v1490_v47 = vld [vmem:[%s2519_s1 + $0x300] sm:$0xf]  ;;  %v1651_v49 = vld [vmem:[%s2519_s1 + $0x304] sm:$0xf0]  ;;  %v1387_v58 = vor.u32 %v1625_v41, %v1386_v40  ;;  %v1135_v60 = vor.u32 %v1560_v42, %v1132_v46  ;;  %v1356_v0 = vld [vmem:[%s2519_s1 + $0x1f8] sm:$0xf0] }
  0x2a   :  { %879 = vmatpush.bf16.msrb.mxu2 %v1523_v63  ;;  %v1442_v52 = vld [vmem:[%s2519_s1 + $0x2a0] sm:$0xf]  ;;  %v1639_v55 = vld [vmem:[%s2519_s1 + $0x2a4] sm:$0xf0]  ;;  %v1491_v62 = vor.u32 %v1651_v49, %v1490_v47  ;;  %v1616_v63 = vld [vmem:[%s2519_s1 + $0x1f4] sm:$0xf] }
  0x2b   :  { %896 = vmatpush.bf16.msrb.mxu3 %v1159_v7  ;;  %v1378_v59 = vld [vmem:[%s2519_s1 + $0x220] sm:$0xf]  ;;  %v1623_v61 = vld [vmem:[%s2519_s1 + $0x224] sm:$0xf0]  ;;  %v1443_v1 = vor.u32 %v1639_v55, %v1442_v52  ;;  %v1558_v2 = vld [vmem:[%s2519_s1 + $0x24] sm:$0xf]  ;;  %v1359_v4 = vor.u32 %v1616_v63, %v1356_v0 }
  0x2c   :  { %840 = vmatpush.bf16.msrb.mxu0 %v1403_v18  ;;  %v1124_v3 = vld [vmem:[%s2519_s1 + $0x28] sm:$0xf0]  ;;  %v1434_v5 = vld [vmem:[%s2519_s1 + $0x290] sm:$0xf]  ;;  %v1637_v6 = vld [vmem:[%s2519_s1 + $0x294] sm:$0xf0]  ;;  %v1379_v8 = vor.u32 %v1623_v61, %v1378_v59 }
  0x2d   :  { %859 = vmatpush.bf16.msrb.mxu1 %v1467_v12  ;;  %v1614_v7 = vld [vmem:[%s2519_s1 + $0x1e4] sm:$0xf]  ;;  %v1348_v9 = vld [vmem:[%s2519_s1 + $0x1e8] sm:$0xf0]  ;;  %v1127_v10 = vor.u32 %v1558_v2, %v1124_v3  ;;  %v1621_v12 = vld [vmem:[%s2519_s1 + $0x214] sm:$0xf0]  ;;  %v1435_v13 = vor.u32 %v1637_v6, %v1434_v5 }
  0x2e   :  { %880 = vmatpush.bf16.msrb.mxu2 %v1515_v11  ;;  %v1370_v11 = vld [vmem:[%s2519_s1 + $0x210] sm:$0xf]  ;;  %v1556_v14 = vld [vmem:[%s2519_s1 + $0x14] sm:$0xf]  ;;  %v1116_v15 = vld [vmem:[%s2519_s1 + $0x18] sm:$0xf0]  ;;  %v1351_v17 = vor.u32 %v1614_v7, %v1348_v9 }
  0x2f   :  { %897 = vmatpush.bf16.msrb.mxu3 %v1151_v22  ;;  %v1426_v16 = vld [vmem:[%s2519_s1 + $0x280] sm:$0xf]  ;;  %v1635_v18 = vld [vmem:[%s2519_s1 + $0x284] sm:$0xf0]  ;;  %v1612_v19 = vld [vmem:[%s2519_s1 + $0x1d4] sm:$0xf]  ;;  %v1371_v21 = vor.u32 %v1621_v12, %v1370_v11  ;;  %v1119_v25 = vor.u32 %v1556_v14, %v1116_v15 }
  0x30   :  { %841 = vmatpush.bf16.msrb.mxu0 %v1395_v35  ;;  %v1340_v20 = vld [vmem:[%s2519_s1 + $0x1d8] sm:$0xf0]  ;;  %v1362_v22 = vld [vmem:[%s2519_s1 + $0x200] sm:$0xf]  ;;  %v1600_v23 = vld [vmem:[%s2519_s1 + $0x174] sm:$0xf]  ;;  %v1427_v29 = vor.u32 %v1635_v18, %v1426_v16 }
  0x31   :  { %860 = vmatpush.bf16.msrb.mxu1 %v1459_v27  ;;  %v1292_v24 = vld [vmem:[%s2519_s1 + $0x178] sm:$0xf0]  ;;  %v1554_v27 = vld [vmem:[%s2519_s1 + $0x4] sm:$0xf]  ;;  %v1108_v28 = vld [vmem:[%s2519_s1 + $0x8] sm:$0xf0]  ;;  %v1343_v35 = vor.u32 %v1612_v19, %v1340_v20 }
  0x32   :  { %881 = vmatpush.bf16.msrb.mxu2 %v1507_v26  ;;  %v1619_v26 = vld [vmem:[%s2519_s1 + $0x204] sm:$0xf0]  ;;  %v1066_v30 = vld [vmem:[%s2520_s0 + $0x10] sm:$0xf]  ;;  %v1545_v31 = vld [vmem:[%s2520_s0 + $0x28] sm:$0xf0]  ;;  %v1295_v36 = vor.u32 %v1600_v23, %v1292_v24 }
  0x33   :  { %898 = vmatpush.bf16.msrb.mxu3 %v1143_v39  ;;  %775 = vmatmul.bf16.gmra.mxu0 %v2065_v44  ;;  %v1584_v32 = vld [vmem:[%s2519_s1 + $0xf4] sm:$0xf]  ;;  %v1228_v33 = vld [vmem:[%s2519_s1 + $0xf8] sm:$0xf0]  ;;  %v1610_v38 = vld [vmem:[%s2519_s1 + $0x1c4] sm:$0xf]  ;;  %v1363_v40 = vor.u32 %v1619_v26, %v1362_v22 }
  0x34   :  { %794 = vmatmul.bf16.gmra.mxu1 %v2076_v50  ;;  %842 = vmatpush.bf16.msrb.mxu0 %v1387_v58  ;;  %v1632_v34 = vld [vmem:[%s2519_s1 + $0x274] sm:$0xf]  ;;  %v1420_v37 = vld [vmem:[%s2519_s1 + $0x278] sm:$0xf0]  ;;  %v1332_v39 = vld [vmem:[%s2519_s1 + $0x1c8] sm:$0xf0]  ;;  %v1231_v47 = vor.u32 %v1584_v32, %v1228_v33 }
  0x35   :  { %861 = vmatpush.bf16.msrb.mxu1 %v1451_v45  ;;  %813 = vmatmul.bf16.gmra.mxu2 %v2078_v51  ;;  %v1542_v41 = vld [vmem:[%s2520_s0 + $0x14] sm:$0xf]  ;;  %v1068_v42 = vld [vmem:[%s2520_s0 + $0x2c] sm:$0xf0]  ;;  %v1111_v45 = vor.u32 %v1554_v27, %v1108_v28  ;;  %v1582_v49 = vld [vmem:[%s2519_s1 + $0xe4] sm:$0xf]  ;;  %v1423_v55 = vor.u32 %v1632_v34, %v1420_v37  ;;  %v1335_v61 = vor.u32 %v1610_v38, %v1332_v39 }
  0x36   :  { %882 = vmatpush.bf16.msrb.mxu2 %v1499_v43  ;;  %832 = vmatmul.bf16.gmra.mxu3 %v2086_v56  ;;  %v1074_v43 = vld [vmem:[%s2520_s0 + $0x18] sm:$0xf]  ;;  %v1546_v46 = vld [vmem:[%s2520_s0 + $0x30] sm:$0xf0]  ;;  %v1220_v52 = vld [vmem:[%s2519_s1 + $0xe8] sm:$0xf0]  ;;  %v2217_v63 = vor.u32 %v1542_v41, %v1068_v42 }
  0x37   :  { %899 = vmatpush.bf16.msrb.mxu3 %v1135_v60  ;;  %v1598_v58 = vld [vmem:[%s2519_s1 + $0x164] sm:$0xf]  ;;  %v1284_v59 = vld [vmem:[%s2519_s1 + $0x168] sm:$0xf0]  ;;  %v1324_v2 = vld [vmem:[%s2519_s1 + $0x1b8] sm:$0xf0]  ;;  %v2228_v3 = vor.u32 %v1546_v46, %v1074_v43 }
  0x38   :  { %843 = vmatpush.bf16.msrb.mxu0 %v1379_v8  ;;  %v1630_v60 = vld [vmem:[%s2519_s1 + $0x264] sm:$0xf]  ;;  %v1412_v0 = vld [vmem:[%s2519_s1 + $0x268] sm:$0xf0]  ;;  %v1287_v5 = vor.u32 %v1598_v58, %v1284_v59  ;;  %v1580_v6 = vld [vmem:[%s2519_s1 + $0xd4] sm:$0xf] }
  0x39   :  { %862 = vmatpush.bf16.msrb.mxu1 %v1443_v1  ;;  %v1608_v1 = vld [vmem:[%s2519_s1 + $0x1b4] sm:$0xf]  ;;  %v1212_v7 = vld [vmem:[%s2519_s1 + $0xd8] sm:$0xf0]  ;;  %v1415_v8 = vor.u32 %v1630_v60, %v1412_v0  ;;  %v1606_v14 = vld [vmem:[%s2519_s1 + $0x1a4] sm:$0xf] }
  0x3a   :  { %883 = vmatpush.bf16.msrb.mxu2 %v1491_v62  ;;  %v2215_v62 = vor.u32 %v1545_v31, %v1066_v30  ;;  %v1596_v9 = vld [vmem:[%s2519_s1 + $0x154] sm:$0xf]  ;;  %v1327_v12 = vor.u32 %v1608_v1, %v1324_v2  ;;  %v1316_v15 = vld [vmem:[%s2519_s1 + $0x1a8] sm:$0xf0]  ;;  %v1215_v16 = vor.u32 %v1580_v6, %v1212_v7  ;;  %v1578_v18 = vld [vmem:[%s2519_s1 + $0xc4] sm:$0xf] }
  0x3b   :  { %900 = vmatpush.bf16.msrb.mxu3 %v1127_v10  ;;  %v1276_v10 = vld [vmem:[%s2519_s1 + $0x158] sm:$0xf0]  ;;  %v1628_v11 = vld [vmem:[%s2519_s1 + $0x254] sm:$0xf]  ;;  %v1204_v19 = vld [vmem:[%s2519_s1 + $0xc8] sm:$0xf0]  ;;  %v1319_v23 = vor.u32 %v1606_v14, %v1316_v15 }
  0x3c   :  { %844 = vmatpush.bf16.msrb.mxu0 %v1371_v21  ;;  %v1594_v21 = vld [vmem:[%s2519_s1 + $0x144] sm:$0xf]  ;;  %v1396_v24 = vld [vmem:[%s2519_s1 + $0x248] sm:$0xf0]  ;;  %v1308_v26 = vld [vmem:[%s2519_s1 + $0x198] sm:$0xf0]  ;;  %v1207_v27 = vor.u32 %v1578_v18, %v1204_v19 }
  0x3d   :  { %863 = vmatpush.bf16.msrb.mxu1 %v1435_v13  ;;  %v1404_v13 = vld [vmem:[%s2519_s1 + $0x258] sm:$0xf0]  ;;  %v1626_v22 = vld [vmem:[%s2519_s1 + $0x244] sm:$0xf]  ;;  %v1094_v32 = vld [vmem:[%s2520_s0 + $0x48] sm:$0xf] }
  0x3e   :  { %952 = vmatpush.bf16.msra.mxu2 %v1359_v4  ;;  %v1223_v4 = vor.u32 %v1582_v49, %v1220_v52  ;;  %v1407_v20 = vor.u32 %v1628_v11, %v1404_v13  ;;  %v1196_v30 = vld [vmem:[%s2519_s1 + $0xb8] sm:$0xf0]  ;;  %v1399_v31 = vor.u32 %v1626_v22, %v1396_v24  ;;  %v1552_v33 = vld [vmem:[%s2520_s0 + $0x60] sm:$0xf0]  ;;  %v1592_v34 = vld [vmem:[%s2519_s1 + $0x134] sm:$0xf] }
  0x3f   :  { %901 = vmatpush.bf16.msrb.mxu3 %v1119_v25  ;;  %v1604_v25 = vld [vmem:[%s2519_s1 + $0x194] sm:$0xf]  ;;  %v1388_v38 = vld [vmem:[%s2519_s1 + $0x238] sm:$0xf0]  ;;  %v1602_v39 = vld [vmem:[%s2519_s1 + $0x184] sm:$0xf]  ;;  %v2340_v0 = vor.u32 %v1552_v33, %v1094_v32 }
  0x40   :  { %845 = vmatpush.bf16.msrb.mxu0 %v1363_v40  ;;  %v1311_v37 = vor.u32 %v1604_v25, %v1308_v26  ;;  %v1300_v40 = vld [vmem:[%s2519_s1 + $0x188] sm:$0xf0]  ;;  %v1096_v42 = vld [vmem:[%s2520_s0 + $0x64] sm:$0xf0]  ;;  %v1102_v43 = vld [vmem:[%s2520_s0 + $0x50] sm:$0xf] }
  0x41   :  { %864 = vmatpush.bf16.msrb.mxu1 %v1427_v29  ;;  %v1576_v29 = vld [vmem:[%s2519_s1 + $0xb4] sm:$0xf]  ;;  %v1549_v41 = vld [vmem:[%s2520_s0 + $0x4c] sm:$0xf]  ;;  %v1574_v49 = vld [vmem:[%s2519_s1 + $0xa4] sm:$0xf] }
  0x42   :  { %953 = vmatpush.bf16.msra.mxu2 %v1351_v17  ;;  %v1279_v17 = vor.u32 %v1596_v9, %v1276_v10  ;;  %v1199_v46 = vor.u32 %v1576_v29, %v1196_v30  ;;  %v1188_v52 = vld [vmem:[%s2519_s1 + $0xa8] sm:$0xf0]  ;;  %v1590_v58 = vld [vmem:[%s2519_s1 + $0x124] sm:$0xf]  ;;  %v2342_v1 = vor.u32 %v1549_v41, %v1096_v42  ;;  %v1572_v9 = vld [vmem:[%s2519_s1 + $0x94] sm:$0xf] }
  0x43   :  { %902 = vmatpush.bf16.msrb.mxu3 %v1111_v45  ;;  %846 = vmatmul.bf16.vlgmr.msrb.gmra.mxu0 %v2215_v62  ;;  %v1553_v45 = vld [vmem:[%s2520_s0 + $0x68] sm:$0xf0]  ;;  %v1622_v60 = vld [vmem:[%s2519_s1 + $0x224] sm:$0xf]  ;;  %v1191_v7 = vor.u32 %v1574_v49, %v1188_v52  ;;  %v1180_v10 = vld [vmem:[%s2519_s1 + $0x98] sm:$0xf0] }
  0x44   :  { %914 = vmatpush.bf16.msra.mxu0 %v1231_v47  ;;  %865 = vmatmul.bf16.vlgmr.msrb.gmra.mxu1 %v2217_v63  ;;  %v1252_v59 = vld [vmem:[%s2519_s1 + $0x128] sm:$0xf0]  ;;  %v2353_v6 = vor.u32 %v1553_v45, %v1102_v43  ;;  %v1244_v13 = vld [vmem:[%s2519_s1 + $0x118] sm:$0xf0]  ;;  %v1620_v14 = vld [vmem:[%s2519_s1 + $0x214] sm:$0xf]  ;;  %v1183_v19 = vor.u32 %v1572_v9, %v1180_v10 }
  0x45   :  { %933 = vmatpush.bf16.msra.mxu1 %v1295_v36  ;;  %1536 = vmatmul.msk.bf16.vlgmr.msrb.gmra.mxu2 %vm755_vm0, %v2228_v3  ;;  %v1624_v36 = vld [vmem:[%s2519_s1 + $0x234] sm:$0xf]  ;;  %v1380_v2 = vld [vmem:[%s2519_s1 + $0x228] sm:$0xf0]  ;;  %v1618_v25 = vld [vmem:[%s2519_s1 + $0x204] sm:$0xf] }
  0x46   :  { %954 = vmatpush.bf16.msra.mxu2 %v1343_v35  ;;  %903 = vmatmul.bf16.vlgmr.msrb.gmra.mxu3 %v1933_v48  ;;  %v1268_v48 = vld [vmem:[%s2519_s1 + $0x148] sm:$0xf0]  ;;  %v1260_v35 = vld [vmem:[%s2519_s1 + $0x138] sm:$0xf0]  ;;  %v1383_v11 = vor.u32 %v1622_v60, %v1380_v2  ;;  %v1644_v29 = vld [vmem:[%s2519_s1 + $0x2d4] sm:$0xf] }
  0x47   :  { %971 = vmatpush.bf16.msra.mxu3 %v1423_v55  ;;  %v1271_v28 = vor.u32 %v1594_v21, %v1268_v48  ;;  %v1263_v47 = vor.u32 %v1592_v34, %v1260_v35  ;;  %v1391_v55 = vor.u32 %v1624_v36, %v1388_v38  ;;  %v1476_v18 = vld [vmem:[%s2519_s1 + $0x2e8] sm:$0xf0]  ;;  %v1570_v21 = vld [vmem:[%s2519_s1 + $0x84] sm:$0xf]  ;;  %v1468_v30 = vld [vmem:[%s2519_s1 + $0x2d8] sm:$0xf0] }
  0x48   :  { %915 = vmatpush.bf16.msra.mxu0 %v1223_v4  ;;  %v1648_v4 = vld [vmem:[%s2519_s1 + $0x2f4] sm:$0xf]  ;;  %v1172_v22 = vld [vmem:[%s2519_s1 + $0x88] sm:$0xf0]  ;;  %v1471_v35 = vor.u32 %v1644_v29, %v1468_v30  ;;  %v1658_v36 = vld [vmem:[%s2519_s1 + $0x344] sm:$0xf] }
  0x49   :  { %934 = vmatpush.bf16.msra.mxu1 %v1287_v5  ;;  %v1484_v5 = vld [vmem:[%s2519_s1 + $0x2f8] sm:$0xf0]  ;;  %v1364_v26 = vld [vmem:[%s2519_s1 + $0x208] sm:$0xf0]  ;;  %v1642_v38 = vld [vmem:[%s2519_s1 + $0x2c4] sm:$0xf] }
  0x4a   :  { %955 = vmatpush.bf16.msra.mxu2 %v1335_v61  ;;  %v1303_v61 = vor.u32 %v1602_v39, %v1300_v40  ;;  %v1487_v15 = vor.u32 %v1648_v4, %v1484_v5  ;;  %v1367_v33 = vor.u32 %v1618_v25, %v1364_v26  ;;  %v1460_v39 = vld [vmem:[%s2519_s1 + $0x2c8] sm:$0xf0]  ;;  %v1656_v42 = vld [vmem:[%s2519_s1 + $0x334] sm:$0xf]  ;;  %v1516_v43 = vld [vmem:[%s2519_s1 + $0x338] sm:$0xf0] }
  0x4b   :  { %972 = vmatpush.bf16.msra.mxu3 %v1415_v8  ;;  %v1255_v8 = vor.u32 %v1590_v58, %v1252_v59  ;;  %v1463_v41 = vor.u32 %v1642_v38, %v1460_v39  ;;  %v1640_v45 = vld [vmem:[%s2519_s1 + $0x2b4] sm:$0xf]  ;;  %v1654_v52 = vld [vmem:[%s2519_s1 + $0x324] sm:$0xf]  ;;  %v1436_v59 = vld [vmem:[%s2519_s1 + $0x298] sm:$0xf0] }
  0x4c   :  { %916 = vmatpush.bf16.msra.mxu0 %v1215_v16  ;;  %v1372_v16 = vld [vmem:[%s2519_s1 + $0x218] sm:$0xf0]  ;;  %v1636_v58 = vld [vmem:[%s2519_s1 + $0x294] sm:$0xf]  ;;  %v1634_v5 = vld [vmem:[%s2519_s1 + $0x284] sm:$0xf] }
  0x4d   :  { %935 = vmatpush.bf16.msra.mxu1 %v1279_v17  ;;  %v1646_v17 = vld [vmem:[%s2519_s1 + $0x2e4] sm:$0xf]  ;;  %v1375_v48 = vor.u32 %v1620_v14, %v1372_v16  ;;  %v1652_v60 = vld [vmem:[%s2519_s1 + $0x314] sm:$0xf]  ;;  %v1439_v2 = vor.u32 %v1636_v58, %v1436_v59  ;;  %v1492_v9 = vld [vmem:[%s2519_s1 + $0x308] sm:$0xf0] }
  0x4e   :  { %956 = vmatpush.bf16.msra.mxu2 %v1327_v12  ;;  %v1588_v12 = vld [vmem:[%s2519_s1 + $0x114] sm:$0xf]  ;;  %v1479_v24 = vor.u32 %v1646_v17, %v1476_v18  ;;  %v2491_v14 = vld [vmem:[%s2521_s2] sm:$0x3] }
  0x4f   :  { %973 = vmatpush.bf16.msra.mxu3 %v1407_v20  ;;  %v1247_v20 = vor.u32 %v1588_v12, %v1244_v13 }
  0x50   :  { %917 = vmatpush.bf16.msra.mxu0 %v1207_v27  ;;  %v1660_v27 = vld [vmem:[%s2519_s1 + $0x354] sm:$0xf] }
  0x51   :  { %936 = vmatpush.bf16.msra.mxu1 %v1271_v28  ;;  %v1532_v28 = vld [vmem:[%s2519_s1 + $0x358] sm:$0xf0] }
  0x52   :  { %957 = vmatpush.bf16.msra.mxu2 %v1319_v23  ;;  %v1586_v23 = vld [vmem:[%s2519_s1 + $0x104] sm:$0xf]  ;;  %v1535_v34 = vor.u32 %v1660_v27, %v1532_v28 }
  0x53   :  { %974 = vmatpush.bf16.msra.mxu3 %v1399_v31  ;;  %851 = vmatmul.bf16.gmra.mxu0 %v2340_v0  ;;  %v1175_v31 = vor.u32 %v1570_v21, %v1172_v22 }
  0x54   :  { %918 = vmatpush.bf16.msra.mxu0 %v1199_v46  ;;  %870 = vmatmul.bf16.gmra.mxu1 %v2342_v1  ;;  %v1452_v46 = vld [vmem:[%s2519_s1 + $0x2b8] sm:$0xf0] }
  0x55   :  { %937 = vmatpush.bf16.msra.mxu1 %v1263_v47  ;;  %1537 = vmatmul.msk.bf16.gmra.mxu2 %vm755_vm0, %v2353_v6  ;;  %v1519_v47 = vor.u32 %v1656_v42, %v1516_v43  ;;  %v1455_v49 = vor.u32 %v1640_v45, %v1452_v46 }
  0x56   :  { %958 = vmatpush.bf16.msra.mxu2 %v1311_v37  ;;  %908 = vmatmul.bf16.gmra.mxu3 %v2065_v44  ;;  %v1236_v44 = vld [vmem:[%s2519_s1 + $0x108] sm:$0xf0] }
  0x57   :  { %975 = vmatpush.bf16.msra.mxu3 %v1391_v55  ;;  %v1239_v32 = vor.u32 %v1586_v23, %v1236_v44  ;;  %v1524_v37 = vld [vmem:[%s2519_s1 + $0x348] sm:$0xf0] }
  0x58   :  { %919 = vmatpush.bf16.msra.mxu0 %v1191_v7  ;;  %v1527_v40 = vor.u32 %v1658_v36, %v1524_v37  ;;  %v1428_v7 = vld [vmem:[%s2519_s1 + $0x288] sm:$0xf0] }
  0x59   :  { %938 = vmatpush.bf16.msra.mxu1 %v1255_v8  ;;  %v1650_v8 = vld [vmem:[%s2519_s1 + $0x304] sm:$0xf]  ;;  %v1431_v10 = vor.u32 %v1634_v5, %v1428_v7 }
  0x5a   :  { %959 = vmatpush.bf16.msra.mxu2 %v1303_v61  ;;  %v1500_v61 = vld [vmem:[%s2519_s1 + $0x318] sm:$0xf0] }
  0x5b   :  { %976 = vmatpush.bf16.msra.mxu3 %v1383_v11  ;;  %v1503_v4 = vor.u32 %v1652_v60, %v1500_v61  ;;  %v1495_v11 = vor.u32 %v1650_v8, %v1492_v9 }
  0x5c   :  { %920 = vmatpush.bf16.msra.mxu0 %v1183_v19 }
  0x5d   :  { %939 = vmatpush.bf16.msra.mxu1 %v1247_v20 }
  0x5e   :  { %1662 = vmatpush.bf16.msrb.mxu2 %v1487_v15 }
  0x5f   :  { %977 = vmatpush.bf16.msra.mxu3 %v1375_v48 }
  0x60   :  { %921 = vmatpush.bf16.msra.mxu0 %v1175_v31 }
  0x61   :  { %940 = vmatpush.bf16.msra.mxu1 %v1239_v32 }
  0x62   :  { %1663 = vmatpush.bf16.msrb.mxu2 %v1479_v24 }
  0x63   :  { %978 = vmatpush.bf16.msra.mxu3 %v1367_v33  ;;  %922 = vmatmul.bf16.vlgmr.msra.gmra.mxu0 %v1944_v53  ;;  %v1508_v53 = vld [vmem:[%s2519_s1 + $0x328] sm:$0xf0] }
  0x64   :  { %990 = vmatpush.bf16.msrb.mxu0 %v1487_v15  ;;  %941 = vmatmul.bf16.vlgmr.msra.gmra.mxu1 %v1946_v54  ;;  %v1638_v54 = vld [vmem:[%s2519_s1 + $0x2a4] sm:$0xf] }
  0x65   :  { %1011 = vmatpush.bf16.msrb.mxu1 %v1535_v34  ;;  %960 = vmatmul.bf16.vlgmr.msra.gmra.mxu2 %v1954_v57  ;;  %v1444_v57 = vld [vmem:[%s2519_s1 + $0x2a8] sm:$0xf0] }
  0x66   :  { %1664 = vmatpush.bf16.msrb.mxu2 %v1471_v35  ;;  %979 = vmatmul.bf16.vlgmr.msra.gmra.mxu3 %v2215_v62  ;;  %v1511_v62 = vor.u32 %v1654_v52, %v1508_v53  ;;  %v1447_v55 = vor.u32 %v1638_v54, %v1444_v57 }
  0x67   :  { %1670 = vmatpush.bf16.msrb.mxu3 %v1535_v34 }
  0x68   :  { %991 = vmatpush.bf16.msrb.mxu0 %v1479_v24 }
  0x69   :  { %1012 = vmatpush.bf16.msrb.mxu1 %v1527_v40 }
  0x6a   :  { %1665 = vmatpush.bf16.msrb.mxu2 %v1463_v41 }
  0x6b   :  { %1671 = vmatpush.bf16.msrb.mxu3 %v1527_v40 }
  0x6c   :  { %992 = vmatpush.bf16.msrb.mxu0 %v1471_v35 }
  0x6d   :  { %1013 = vmatpush.bf16.msrb.mxu1 %v1519_v47 }
  0x6e   :  { %1666 = vmatpush.bf16.msrb.mxu2 %v1455_v49 }
  0x6f   :  { %1672 = vmatpush.bf16.msrb.mxu3 %v1519_v47 }
  0x70   :  { %993 = vmatpush.bf16.msrb.mxu0 %v1463_v41 }
  0x71   :  { %1014 = vmatpush.bf16.msrb.mxu1 %v1511_v62 }
  0x72   :  { %1667 = vmatpush.bf16.msrb.mxu2 %v1447_v55 }
  0x73   :  { %1673 = vmatpush.bf16.msrb.mxu3 %v1511_v62  ;;  %927 = vmatmul.bf16.gmra.mxu0 %v2076_v50 }
  0x74   :  { %994 = vmatpush.bf16.msrb.mxu0 %v1455_v49  ;;  %946 = vmatmul.bf16.gmra.mxu1 %v2078_v51 }
  0x75   :  { %1015 = vmatpush.bf16.msrb.mxu1 %v1503_v4  ;;  %965 = vmatmul.bf16.gmra.mxu2 %v2086_v56 }
  0x76   :  { %1668 = vmatpush.bf16.msrb.mxu2 %v1439_v2  ;;  %984 = vmatmul.bf16.gmra.mxu3 %v2340_v0 }
  0x77   :  { %1674 = vmatpush.bf16.msrb.mxu3 %v1503_v4 }
  0x78   :  { %995 = vmatpush.bf16.msrb.mxu0 %v1447_v55 }
  0x79   :  { %1016 = vmatpush.bf16.msrb.mxu1 %v1495_v11 }
  0x7a   :  { %1669 = vmatpush.bf16.msrb.mxu2 %v1431_v10 }
  0x7b   :  { %1675 = vmatpush.bf16.msrb.mxu3 %v1495_v11 }
  0x7c   :  { %996 = vmatpush.bf16.msrb.mxu0 %v1439_v2 }
  0x80   :  { %997 = vmatpush.bf16.msrb.mxu0 %v1431_v10 }
  0x83   :  { %998 = vmatmul.bf16.vlgmr.msrb.gmra.mxu0 %v2217_v63 }
  0x84   :  { %1538 = vmatmul.msk.bf16.vlgmr.msrb.gmra.mxu1 %vm755_vm0, %v2228_v3  ;;  %v141_v3 = vperm.slane %v2491_v14, 0 }
  0x85   :  { %1003 = vmatmul.bf16.vlgmr.msrb.gmra.mxu2 %v2342_v1 }
  0x86   :  { %1539 = vmatmul.msk.bf16.vlgmr.msrb.gmra.mxu3 %vm755_vm0, %v2353_v6 }
  0xa0   :  { %v771_v50 = vpop.f32.mrf.mxu0 }
  0xa1   :  { %v790_v51 = vpop.f32.mrf.mxu1  ;;  %v772_v17 = vadd.f32 %v771_v50, %v141_v3 }
  0xa3   :  { %v791_v20 = vadd.f32 %v790_v51, %v772_v17 }
  0xa8   :  { %v809_v56 = vpop.f32.mrf.mxu2  ;;  %v773_v0 = vpop.f32.mrf.mxu0 }
  0xa9   :  { %v828_v12 = vpop.f32.mrf.mxu3  ;;  %v792_v13 = vpop.f32.mrf.mxu1  ;;  %v810_v48 = vadd.f32 %v809_v56, %v791_v20  ;;  %v774_v22 = vadd.f32 %v773_v0, %v141_v3 }
  0xab   :  { %v829_v24 = vadd.f32 %v828_v12, %v810_v48  ;;  %v793_v27 = vadd.f32 %v792_v13, %v774_v22 }
  0xb0   :  { %v811_v63 = vpop.f32.mrf.mxu2  ;;  %v776_v16 = vpop.f32.mrf.mxu0 }
  0xb1   :  { %v830_v15 = vpop.f32.mrf.mxu3  ;;  %v795_v1 = vpop.f32.mrf.mxu1  ;;  %v812_v29 = vadd.f32 %v811_v63, %v793_v27  ;;  %v777_v30 = vadd.f32 %v776_v16, %v141_v3  ;;  %v142_v16 = vperm.slane %v2491_v14, 1 }
  0xb3   :  { %v831_v34 = vadd.f32 %v830_v15, %v812_v29  ;;  %v796_v35 = vadd.f32 %v795_v1, %v777_v30 }
  0xb8   :  { %v814_v18 = vpop.f32.mrf.mxu2  ;;  %v778_v19 = vpop.f32.mrf.mxu0 }
  0xb9   :  { %v833_v6 = vpop.f32.mrf.mxu3  ;;  %v797_v21 = vpop.f32.mrf.mxu1  ;;  %v815_v41 = vadd.f32 %v814_v18, %v796_v35  ;;  %v779_v42 = vadd.f32 %v778_v19, %v141_v3 }
  0xbb   :  { %v834_v47 = vadd.f32 %v833_v6, %v815_v41  ;;  %v798_v54 = vadd.f32 %v797_v21, %v779_v42 }
  0xc0   :  { %v816_v23 = vpop.f32.mrf.mxu2  ;;  %v847_v25 = vpop.f32.mrf.mxu0 }
  0xc1   :  { %v835_v44 = vpop.f32.mrf.mxu3  ;;  %v866_v26 = vpop.f32.mrf.mxu1  ;;  %v848_v28 = vadd.f32 %v847_v25, %v829_v24  ;;  %v817_v55 = vadd.f32 %v816_v23, %v798_v54 }
  0xc3   :  { %v867_v31 = vadd.f32 %v866_v26, %v848_v28  ;;  %v836_v61 = vadd.f32 %v835_v44, %v817_v55 }
  0xc8   :  { %v885_v32 = vpop.f32.mrf.mxu2  ;;  %v849_v37 = vpop.f32.mrf.mxu0 }
  0xc9   :  { %v904_v33 = vpop.f32.mrf.mxu3  ;;  %v886_v36 = vadd.f32 %v885_v32, %v867_v31  ;;  %v868_v38 = vpop.f32.mrf.mxu1  ;;  %v850_v40 = vadd.f32 %v849_v37, %v831_v34 }
  0xca   :  { %v905_v6 = vadd.f32 %v904_v33, %v142_v16 }
  0xcb   :  { %v1028_v39 = vmax.f32 %v886_v36, 0.0  ;;  %v869_v43 = vadd.f32 %v868_v38, %v850_v40 }
  0xcd   :  { %1036 = vst [vmem:[%s2522_s3] sm:$0xff] %v1028_v39 }
  0xd0   :  { %v887_v45 = vpop.f32.mrf.mxu2  ;;  %v852_v52 = vpop.f32.mrf.mxu0 }
  0xd1   :  { %v906_v46 = vpop.f32.mrf.mxu3  ;;  %v888_v49 = vadd.f32 %v887_v45, %v869_v43  ;;  %v871_v53 = vpop.f32.mrf.mxu1  ;;  %v853_v62 = vadd.f32 %v852_v52, %v834_v47 }
  0xd2   :  { %v907_v24 = vadd.f32 %v906_v46, %v142_v16 }
  0xd3   :  { %v1030_v57 = vmax.f32 %v888_v49, 0.0  ;;  %v872_v58 = vadd.f32 %v871_v53, %v853_v62 }
  0xd5   :  { %1038 = vst [vmem:[%s2522_s3 + $0x10] sm:$0xff] %v1030_v57 }
  0xd8   :  { %v890_v59 = vpop.f32.mrf.mxu2  ;;  %v854_v4 = vpop.f32.mrf.mxu0 }
  0xd9   :  { %v909_v60 = vpop.f32.mrf.mxu3  ;;  %v891_v2 = vadd.f32 %v890_v59, %v872_v58  ;;  %v873_v5 = vpop.f32.mrf.mxu1  ;;  %v855_v8 = vadd.f32 %v854_v4, %v836_v61 }
  0xda   :  { %v910_v44 = vadd.f32 %v909_v60, %v142_v16 }
  0xdb   :  { %v1032_v7 = vmax.f32 %v891_v2, 0.0  ;;  %v874_v9 = vadd.f32 %v873_v5, %v855_v8 }
  0xdd   :  { %1040 = vst [vmem:[%s2522_s3 + $0x20] sm:$0xff] %v1032_v7 }
  0xe0   :  { %v892_v10 = vpop.f32.mrf.mxu2  ;;  %v923_v51 = vpop.f32.mrf.mxu0 }
  0xe1   :  { %v911_v11 = vpop.f32.mrf.mxu3  ;;  %v893_v50 = vadd.f32 %v892_v10, %v874_v9  ;;  %v942_v56 = vpop.f32.mrf.mxu1  ;;  %v924_v19 = vadd.f32 %v923_v51, %v905_v6 }
  0xe2   :  { %v912_v33 = vadd.f32 %v911_v11, %v142_v16 }
  0xe3   :  { %v1034_v12 = vmax.f32 %v893_v50, 0.0  ;;  %v943_v23 = vadd.f32 %v942_v56, %v924_v19 }
  0xe5   :  { %1042 = vst [vmem:[%s2522_s3 + $0x30] sm:$0xff] %v1034_v12 }
  0xe8   :  { %v961_v0 = vpop.f32.mrf.mxu2  ;;  %v925_v63 = vpop.f32.mrf.mxu0 }
  0xe9   :  { %v980_v13 = vpop.f32.mrf.mxu3  ;;  %v944_v15 = vpop.f32.mrf.mxu1  ;;  %v962_v25 = vadd.f32 %v961_v0, %v943_v23  ;;  %v926_v27 = vadd.f32 %v925_v63, %v907_v24 }
  0xeb   :  { %v981_v28 = vadd.f32 %v980_v13, %v962_v25  ;;  %v945_v34 = vadd.f32 %v944_v15, %v926_v27 }
  0xf0   :  { %v963_v3 = vpop.f32.mrf.mxu2  ;;  %v928_v17 = vpop.f32.mrf.mxu0 }
  0xf1   :  { %v982_v1 = vpop.f32.mrf.mxu3  ;;  %v947_v18 = vpop.f32.mrf.mxu1  ;;  %v929_v26 = vadd.f32 %v928_v17, %v910_v44  ;;  %v964_v37 = vadd.f32 %v963_v3, %v945_v34 }
  0xf3   :  { %v948_v14 = vadd.f32 %v947_v18, %v929_v26  ;;  %v983_v42 = vadd.f32 %v982_v1, %v964_v37 }
  0xf8   :  { %v966_v20 = vpop.f32.mrf.mxu2  ;;  %v930_v48 = vpop.f32.mrf.mxu0 }
  0xf9   :  { %v985_v21 = vpop.f32.mrf.mxu3  ;;  %v949_v22 = vpop.f32.mrf.mxu1  ;;  %v967_v36 = vadd.f32 %v966_v20, %v948_v14  ;;  %v931_v39 = vadd.f32 %v930_v48, %v912_v33 }
  0xfb   :  { %v986_v41 = vadd.f32 %v985_v21, %v967_v36  ;;  %v950_v46 = vadd.f32 %v949_v22, %v931_v39 }
 0x100   :  { %v968_v29 = vpop.f32.mrf.mxu2  ;;  %v999_v31 = vpop.f32.mrf.mxu0 }
 0x101   :  { %v987_v30 = vpop.f32.mrf.mxu3  ;;  %v1018_v32 = vpop.f32.mrf.mxu1  ;;  %v1000_v35 = vadd.f32 %v999_v31, %v981_v28  ;;  %v969_v53 = vadd.f32 %v968_v29, %v950_v46 }
 0x103   :  { %v1019_v38 = vadd.f32 %v1018_v32, %v1000_v35  ;;  %v988_v59 = vadd.f32 %v987_v30, %v969_v53 }
 0x105   :  { %v1029_v40 = vmax.f32 %v1019_v38, 0.0 }
 0x107   :  { %1037 = vst [vmem:[%s2522_s3 + $0x8] sm:$0xff] %v1029_v40 }
 0x108   :  { %v1004_v43 = vpop.f32.mrf.mxu2  ;;  %v1001_v49 = vpop.f32.mrf.mxu0 }
 0x109   :  { %v1023_v45 = vpop.f32.mrf.mxu3  ;;  %v1005_v47 = vadd.f32 %v1004_v43, %v986_v41  ;;  %v1002_v52 = vadd.f32 %v1001_v49, %v983_v42  ;;  %v1020_v57 = vpop.f32.mrf.mxu1 }
 0x10b   :  { %v1024_v54 = vadd.f32 %v1023_v45, %v1005_v47  ;;  %v1021_v62 = vadd.f32 %v1020_v57, %v1002_v52 }
 0x10d   :  { %v1033_v55 = vmax.f32 %v1024_v54, 0.0  ;;  %v1031_v58 = vmax.f32 %v1021_v62, 0.0 }
 0x10f   :  { %1041 = vst [vmem:[%s2522_s3 + $0x28] sm:$0xff] %v1033_v55 }
 0x110   :  { %1039 = vst [vmem:[%s2522_s3 + $0x18] sm:$0xff] %v1031_v58  ;;  %v1006_v60 = vpop.f32.mrf.mxu2 }
 0x111   :  { %v1007_v61 = vadd.f32 %v1006_v60, %v988_v59  ;;  %v1025_v2 = vpop.f32.mrf.mxu3 }
 0x113   :  { %v1026_v4 = vadd.f32 %v1025_v2, %v1007_v61 }
 0x115   :  { %v1035_v5 = vmax.f32 %v1026_v4, 0.0 }
 0x117   :  { %1043 = vst [vmem:[%s2522_s3 + $0x38] sm:$0xff] %v1035_v5 }

</bundles_post_ra>
